<compile_context>
chip_gen: v7x
topology: tpu7x:2x2x1
jax: 0.10.0
libtpu: 0.0.40
codegen_flags: <defaults>
</compile_context>

<pallas_src>
import functools

import jax
import jax.numpy as jnp
from jax import lax
from jax.experimental import pallas as pl
from jax.experimental.pallas import tpu as pltpu


_VMEM_LIMIT_BYTES = 32 * 1024 * 1024  # safe on v5e/v6e (128 MiB) and v7x (64 MiB/core)


# ----------------------------- shared conv tile (in-VMEM im2col) ------------------------


def _conv_tile(x_ref, w_ref, mask_ref, *, KH, KW, W, pad_w, L):
    """Conv output (Cout, L) in f32 for one image, from the flat VMEM-resident tile.

    x_ref    : (1, Cin, Lflat)   H-padded, spatially flattened, front/back padded input
    w_ref    : (KH*KW, Cout, Cin) tap-major weights (resident across the grid)
    mask_ref : (KW, 1, L)        row-edge masks (0/1) for off-centre horizontal taps
    """
    xt = x_ref[0]                                   # (Cin, Lflat)
    acc = None
    for kh in range(KH):
        for kw in range(KW):
            off = kh * W + kw                       # static lane offset of this tap
            sl = xt[:, off:off + L]                 # (Cin, L) shifted slice == im2col tap
            if kw != pad_w:                         # zero lanes that wrapped across rows
                sl = sl * mask_ref[kw]
            part = jnp.dot(w_ref[kh * KW + kw], sl,
                           preferred_element_type=jnp.float32)   # MXU, f32 accumulate
            acc = part if acc is None else acc + part
    return acc                                      # (Cout, L) f32


# ------------------ pass 1: conv recompute -> per-image BN partial stats ----------------


def _conv_stats_kernel(x_ref, w_ref, mask_ref, mean_ref, m2_ref, *, KH, KW, W, pad_w, L):
    acc = _conv_tile(x_ref, w_ref, mask_ref, KH=KH, KW=KW, W=W, pad_w=pad_w, L=L)
    mean_t = jnp.sum(acc, axis=1, keepdims=True) * (1.0 / L)     # (Cout, 1)
    d = acc - mean_t
    m2_t = jnp.sum(d * d, axis=1, keepdims=True)                 # (Cout, 1), shifted (Welford)
    # NOTE: stats stay (1, Cout, 1)-shaped; a lane-major (1, 1, Cout) write would need an
    # in-kernel (Cout,1)->(1,Cout) relayout for a few hundred bytes -- not worth it.
    mean_ref[...] = mean_t[None]
    m2_ref[...] = m2_t[None]


# -------------- pass 2: conv recompute + fused BN scale/bias + LeakyReLU -----------------


def _conv_bn_lrelu_kernel(x_ref, w_ref, mask_ref, scale_ref, bias_ref, o_ref, *,
                          KH, KW, W, pad_w, L, neg_slope):
    acc = _conv_tile(x_ref, w_ref, mask_ref, KH=KH, KW=KW, W=W, pad_w=pad_w, L=L)
    y = acc * scale_ref[...] + bias_ref[...]                     # (Cout, L), f32
    o_ref[...] = jnp.where(y > 0, y, neg_slope * y).astype(o_ref.dtype)[None]


# --------------------------------------- wrapper -----------------------------------------


def cnnblock_forward(x, weight, gamma, beta, *, padding=1, eps=1e-5, neg_slope=0.1,
                     compute_dtype=jnp.bfloat16):
    """x: (N, Cin, H, W) NCHW; weight: (Cout, Cin, KH, KW) OIHW.  Returns NCHW output."""
    N, Cin, H, W = x.shape
    Cout, Cin_w, KH, KW = weight.shape
    assert Cin_w == Cin
    Hout = H + 2 * padding - KH + 1
    Wout = W + 2 * padding - KW + 1
    # The flat shifted-slice formulation needs stride 1 and "same" horizontal padding
    # (row stride of the input equals the output row width).
    # TODO(synk): general stride / padding fall back to an explicit halo'd-block kernel.
    if Wout != W or 2 * padding != KW - 1:
        raise NotImplementedError("cnnblock_forward requires stride=1, 2*padding == KW-1")
    L = Hout * Wout

    # ---- cheap layout plumbing (single pass, no transpose, no im2col expansion) --------
    xv = jnp.pad(x, ((0, 0), (0, 0), (padding, padding), (0, 0)))    # H-pad only
    Lrows = (H + 2 * padding) * W
    front = padding                                                   # aligns tap offsets >= 0
    max_end = (KH - 1) * W + (KW - 1) + L
    back = max(0, max_end - (front + Lrows))
    x_flat = jnp.pad(xv.reshape(N, Cin, Lrows), ((0, 0), (0, 0), (front, back)))
    x_flat = x_flat.astype(compute_dtype)                             # bf16 stream by default
    Lflat = x_flat.shape[-1]

    # tap-major weights: (KH*KW, Cout, Cin), tiny & resident in VMEM across the grid
    w_taps = (jnp.transpose(weight, (2, 3, 0, 1))
              .reshape(KH * KW, Cout, Cin)
              .astype(compute_dtype))

    # row-edge masks (0/1) for horizontal taps kw != padding; tiny & resident
    wpos = jnp.arange(L, dtype=jnp.int32) % Wout
    masks = [((wpos + (kw - padding) >= 0) & (wpos + (kw - padding) < Wout))
             for kw in range(KW)]
    edge_mask = jnp.stack(masks).astype(compute_dtype).reshape(KW, 1, L)

    cparams = pltpu.CompilerParams(
        dimension_semantics=("parallel",),          # v7x megacore splits the batch
        vmem_limit_bytes=_VMEM_LIMIT_BYTES,
    )
    conv_kw = dict(KH=KH, KW=KW, W=W, pad_w=padding, L=L)

    x_spec = pl.BlockSpec((1, Cin, Lflat), lambda n: (n, 0, 0))
    w_spec = pl.BlockSpec((KH * KW, Cout, Cin), lambda n: (0, 0, 0))
    m_spec = pl.BlockSpec((KW, 1, L), lambda n: (0, 0, 0))

    # ---- pass 1: per-image partial BN statistics (no conv intermediate written) --------
    # TODO(synk): for feature maps too large for one VMEM tile per image, add a second
    # grid axis over row blocks (block lane width a multiple of 128*W) here and in pass 2.
    pmean, pm2 = pl.pallas_call(
        functools.partial(_conv_stats_kernel, **conv_kw),
        out_shape=(jax.ShapeDtypeStruct((N, Cout, 1), jnp.float32),
                   jax.ShapeDtypeStruct((N, Cout, 1), jnp.float32)),
        grid=(N,),
        in_specs=[x_spec, w_spec, m_spec],
        out_specs=(pl.BlockSpec((1, Cout, 1), lambda n: (n, 0, 0)),
                   pl.BlockSpec((1, Cout, 1), lambda n: (n, 0, 0))),
        compiler_params=cparams,
    )(x_flat, w_taps, edge_mask)

    # ---- tiny O(N*Cout) Welford combine (avoids E[x^2]-E[x]^2 cancellation) ------------
    tile_mean = pmean[:, :, 0]                                   # (N, Cout)
    tile_m2 = pm2[:, :, 0]                                       # (N, Cout)
    mean = jnp.mean(tile_mean, axis=0)                           # (Cout,)
    m2 = jnp.sum(tile_m2, axis=0) + float(L) * jnp.sum((tile_mean - mean[None, :]) ** 2,
                                                       axis=0)
    var = m2 / float(L * N)                                      # biased var (PyTorch BN train)
    scale = gamma.astype(jnp.float32) * lax.rsqrt(var + eps)
    bias = beta.astype(jnp.float32) - mean * scale
    # TODO(synk): BatchNorm2d running_mean/var buffer updates are module state, not part
    # of the forward output; expose (mean, var) to the caller if those buffers are needed.

    # ---- pass 2: conv recompute + fused scale/bias + LeakyReLU, flattened-NCHW output --
    out = pl.pallas_call(
        functools.partial(_conv_bn_lrelu_kernel, neg_slope=neg_slope, **conv_kw),
        out_shape=jax.ShapeDtypeStruct((N, Cout, L), x.dtype),
        grid=(N,),
        in_specs=[x_spec, w_spec, m_spec,
                  pl.BlockSpec((Cout, 1), lambda n: (0, 0)),
                  pl.BlockSpec((Cout, 1), lambda n: (0, 0))],
        out_specs=pl.BlockSpec((1, Cout, L), lambda n: (n, 0, 0)),
        compiler_params=cparams,
    )(x_flat, w_taps, edge_mask, scale.reshape(Cout, 1), bias.reshape(Cout, 1))

    # contiguous split of the last dim: no transpose, no extra HBM pass
    return out.reshape(N, Cout, Hout, Wout)


def cnnblock_reference(x, weight, gamma, beta, *, padding=1, eps=1e-5, neg_slope=0.1):
    """Pure-JAX reference: Conv2d(bias=False) + BatchNorm2d(train) + LeakyReLU(0.1)."""
    y = lax.conv_general_dilated(
        x, weight, window_strides=(1, 1),
        padding=[(padding, padding), (padding, padding)],
        dimension_numbers=("NCHW", "OIHW", "NCHW"),
    )
    mean = jnp.mean(y, axis=(0, 2, 3), keepdims=True)
    var = jnp.mean((y - mean) ** 2, axis=(0, 2, 3), keepdims=True)
    y = (y - mean) * lax.rsqrt(var + eps)
    y = y * gamma.reshape(1, -1, 1, 1) + beta.reshape(1, -1, 1, 1)
    return jnp.where(y > 0, y, neg_slope * y)


if __name__ == "__main__":
    # Shapes consistent with the module: Conv2d(4 -> 8, kernel_size=3, padding=1).
    N, Cin, H, W = 2, 4, 16, 16
    Cout, KH, KW = 8, 3, 3

    key = jax.random.PRNGKey(0)
    kx, kw_, kg, kb = jax.random.split(key, 4)
    x = jax.random.normal(kx, (N, Cin, H, W), dtype=jnp.float32)
    weight = jax.random.normal(kw_, (Cout, Cin, KH, KW), dtype=jnp.float32) * 0.1
    gamma = 1.0 + 0.1 * jax.random.normal(kg, (Cout,), dtype=jnp.float32)
    beta = 0.1 * jax.random.normal(kb, (Cout,), dtype=jnp.float32)

    ref = cnnblock_reference(x, weight, gamma, beta, padding=1)

    # Tight check with f32 MXU operands (same kernels, compute_dtype=f32).
    fwd32 = jax.jit(functools.partial(cnnblock_forward, padding=1,
                                      compute_dtype=jnp.float32))
    out32 = jax.block_until_ready(fwd32(x, weight, gamma, beta))
    assert out32.shape == (N, Cout, H, W)
    assert jnp.allclose(out32, ref, atol=1e-4, rtol=1e-4), (
        "f32 path mismatch, max abs err = "
        f"{float(jnp.max(jnp.abs(out32 - ref))):.3e}")

    # Default perf path: bf16 operand streams, f32 accumulation / BN statistics.
    fwd = jax.jit(functools.partial(cnnblock_forward, padding=1))
    out = jax.block_until_ready(fwd(x, weight, gamma, beta))
    assert out.shape == (N, Cout, H, W)
    assert jnp.allclose(out, ref, atol=3e-2, rtol=3e-2), (
        "bf16 path mismatch vs f32 reference, max abs err = "
        f"{float(jnp.max(jnp.abs(out - ref))):.3e}")

    print("KERNEL_OK")
</pallas_src>

<mosaic_0001>
module attributes {stable_mosaic.version = 11 : i64} {
  func.func @_conv_stats_kernel(%arg0: i32, %arg1: memref<1x4x290xf32, #tpu.memory_space<vmem>>, %arg2: memref<9x8x4xf32, #tpu.memory_space<vmem>>, %arg3: memref<3x1x256xf32, #tpu.memory_space<vmem>>, %arg4: memref<1x8x1xf32, #tpu.memory_space<vmem>>, %arg5: memref<1x8x1xf32, #tpu.memory_space<vmem>>) attributes {dimension_semantics = [#tpu.dimension_semantics<parallel>], iteration_bounds = array<i64: 2>, scalar_prefetch = 0 : i64, scratch_operands = 0 : i64, tpu.core_type = #tpu.core_type<tc>, window_params = [{transform_indices = @transform_0, window_bounds = array<i64: 1, 4, 290>}, {pipeline_mode = #tpu.pipeline_mode<synchronous>, transform_indices = @transform_1, window_bounds = array<i64: 9, 8, 4>}, {pipeline_mode = #tpu.pipeline_mode<synchronous>, transform_indices = @transform_2, window_bounds = array<i64: 3, 1, 256>}, {transform_indices = @transform_3, window_bounds = array<i64: 1, 8, 1>}, {transform_indices = @transform_4, window_bounds = array<i64: 1, 8, 1>}]} {
    %c0 = arith.constant 0 : index
    %c0_0 = arith.constant 0 : index
    %c0_1 = arith.constant 0 : index
    %0 = vector.load %arg1[%c0, %c0_0, %c0_1] : memref<1x4x290xf32, #tpu.memory_space<vmem>>, vector<1x4x290xf32>
    %1 = vector.shape_cast %0 : vector<1x4x290xf32> to vector<4x290xf32>
    %2 = vector.extract_strided_slice %1 {offsets = [0, 0], sizes = [4, 256], strides = [1, 1]} : vector<4x290xf32> to vector<4x256xf32>
    %c0_2 = arith.constant 0 : index
    %c0_3 = arith.constant 0 : index
    %c0_4 = arith.constant 0 : index
    %3 = vector.load %arg3[%c0_2, %c0_3, %c0_4] : memref<3x1x256xf32, #tpu.memory_space<vmem>>, vector<1x1x256xf32>
    %4 = vector.shape_cast %3 : vector<1x1x256xf32> to vector<1x256xf32>
    %5 = vector.broadcast %4 : vector<1x256xf32> to vector<4x256xf32>
    %6 = arith.mulf %2, %5 : vector<4x256xf32>
    %c0_5 = arith.constant 0 : index
    %c0_6 = arith.constant 0 : index
    %c0_7 = arith.constant 0 : index
    %7 = vector.load %arg2[%c0_5, %c0_6, %c0_7] : memref<9x8x4xf32, #tpu.memory_space<vmem>>, vector<1x8x4xf32>
    %8 = vector.shape_cast %7 : vector<1x8x4xf32> to vector<8x4xf32>
    %cst = arith.constant dense<0.000000e+00> : vector<8x256xf32>
    %9 = tpu.matmul %8, %6, %cst {dimension_numbers = #tpu.dot_dimension_numbers<[1], [0], [0], [1], [0, 0, 1, 1], [], []>} : vector<8x4xf32>, vector<4x256xf32>, vector<8x256xf32> -> vector<8x256xf32>
    %10 = vector.extract_strided_slice %1 {offsets = [0, 1], sizes = [4, 256], strides = [1, 1]} : vector<4x290xf32> to vector<4x256xf32>
    %c1 = arith.constant 1 : index
    %c0_8 = arith.constant 0 : index
    %c0_9 = arith.constant 0 : index
    %11 = vector.load %arg2[%c1, %c0_8, %c0_9] : memref<9x8x4xf32, #tpu.memory_space<vmem>>, vector<1x8x4xf32>
    %12 = vector.shape_cast %11 : vector<1x8x4xf32> to vector<8x4xf32>
    %cst_10 = arith.constant dense<0.000000e+00> : vector<8x256xf32>
    %13 = tpu.matmul %12, %10, %cst_10 {dimension_numbers = #tpu.dot_dimension_numbers<[1], [0], [0], [1], [0, 0, 1, 1], [], []>} : vector<8x4xf32>, vector<4x256xf32>, vector<8x256xf32> -> vector<8x256xf32>
    %14 = arith.addf %9, %13 : vector<8x256xf32>
    %15 = vector.extract_strided_slice %1 {offsets = [0, 2], sizes = [4, 256], strides = [1, 1]} : vector<4x290xf32> to vector<4x256xf32>
    %c2 = arith.constant 2 : index
    %c0_11 = arith.constant 0 : index
    %c0_12 = arith.constant 0 : index
    %16 = vector.load %arg3[%c2, %c0_11, %c0_12] : memref<3x1x256xf32, #tpu.memory_space<vmem>>, vector<1x1x256xf32>
    %17 = vector.shape_cast %16 : vector<1x1x256xf32> to vector<1x256xf32>
    %18 = vector.broadcast %17 : vector<1x256xf32> to vector<4x256xf32>
    %19 = arith.mulf %15, %18 : vector<4x256xf32>
    %c2_13 = arith.constant 2 : index
    %c0_14 = arith.constant 0 : index
    %c0_15 = arith.constant 0 : index
    %20 = vector.load %arg2[%c2_13, %c0_14, %c0_15] : memref<9x8x4xf32, #tpu.memory_space<vmem>>, vector<1x8x4xf32>
    %21 = vector.shape_cast %20 : vector<1x8x4xf32> to vector<8x4xf32>
    %cst_16 = arith.constant dense<0.000000e+00> : vector<8x256xf32>
    %22 = tpu.matmul %21, %19, %cst_16 {dimension_numbers = #tpu.dot_dimension_numbers<[1], [0], [0], [1], [0, 0, 1, 1], [], []>} : vector<8x4xf32>, vector<4x256xf32>, vector<8x256xf32> -> vector<8x256xf32>
    %23 = arith.addf %14, %22 : vector<8x256xf32>
    %24 = vector.extract_strided_slice %1 {offsets = [0, 16], sizes = [4, 256], strides = [1, 1]} : vector<4x290xf32> to vector<4x256xf32>
    %c0_17 = arith.constant 0 : index
    %c0_18 = arith.constant 0 : index
    %c0_19 = arith.constant 0 : index
    %25 = vector.load %arg3[%c0_17, %c0_18, %c0_19] : memref<3x1x256xf32, #tpu.memory_space<vmem>>, vector<1x1x256xf32>
    %26 = vector.shape_cast %25 : vector<1x1x256xf32> to vector<1x256xf32>
    %27 = vector.broadcast %26 : vector<1x256xf32> to vector<4x256xf32>
    %28 = arith.mulf %24, %27 : vector<4x256xf32>
    %c3 = arith.constant 3 : index
    %c0_20 = arith.constant 0 : index
    %c0_21 = arith.constant 0 : index
    %29 = vector.load %arg2[%c3, %c0_20, %c0_21] : memref<9x8x4xf32, #tpu.memory_space<vmem>>, vector<1x8x4xf32>
    %30 = vector.shape_cast %29 : vector<1x8x4xf32> to vector<8x4xf32>
    %cst_22 = arith.constant dense<0.000000e+00> : vector<8x256xf32>
    %31 = tpu.matmul %30, %28, %cst_22 {dimension_numbers = #tpu.dot_dimension_numbers<[1], [0], [0], [1], [0, 0, 1, 1], [], []>} : vector<8x4xf32>, vector<4x256xf32>, vector<8x256xf32> -> vector<8x256xf32>
    %32 = arith.addf %23, %31 : vector<8x256xf32>
    %33 = vector.extract_strided_slice %1 {offsets = [0, 17], sizes = [4, 256], strides = [1, 1]} : vector<4x290xf32> to vector<4x256xf32>
    %c4 = arith.constant 4 : index
    %c0_23 = arith.constant 0 : index
    %c0_24 = arith.constant 0 : index
    %34 = vector.load %arg2[%c4, %c0_23, %c0_24] : memref<9x8x4xf32, #tpu.memory_space<vmem>>, vector<1x8x4xf32>
    %35 = vector.shape_cast %34 : vector<1x8x4xf32> to vector<8x4xf32>
    %cst_25 = arith.constant dense<0.000000e+00> : vector<8x256xf32>
    %36 = tpu.matmul %35, %33, %cst_25 {dimension_numbers = #tpu.dot_dimension_numbers<[1], [0], [0], [1], [0, 0, 1, 1], [], []>} : vector<8x4xf32>, vector<4x256xf32>, vector<8x256xf32> -> vector<8x256xf32>
    %37 = arith.addf %32, %36 : vector<8x256xf32>
    %38 = vector.extract_strided_slice %1 {offsets = [0, 18], sizes = [4, 256], strides = [1, 1]} : vector<4x290xf32> to vector<4x256xf32>
    %c2_26 = arith.constant 2 : index
    %c0_27 = arith.constant 0 : index
    %c0_28 = arith.constant 0 : index
    %39 = vector.load %arg3[%c2_26, %c0_27, %c0_28] : memref<3x1x256xf32, #tpu.memory_space<vmem>>, vector<1x1x256xf32>
    %40 = vector.shape_cast %39 : vector<1x1x256xf32> to vector<1x256xf32>
    %41 = vector.broadcast %40 : vector<1x256xf32> to vector<4x256xf32>
    %42 = arith.mulf %38, %41 : vector<4x256xf32>
    %c5 = arith.constant 5 : index
    %c0_29 = arith.constant 0 : index
    %c0_30 = arith.constant 0 : index
    %43 = vector.load %arg2[%c5, %c0_29, %c0_30] : memref<9x8x4xf32, #tpu.memory_space<vmem>>, vector<1x8x4xf32>
    %44 = vector.shape_cast %43 : vector<1x8x4xf32> to vector<8x4xf32>
    %cst_31 = arith.constant dense<0.000000e+00> : vector<8x256xf32>
    %45 = tpu.matmul %44, %42, %cst_31 {dimension_numbers = #tpu.dot_dimension_numbers<[1], [0], [0], [1], [0, 0, 1, 1], [], []>} : vector<8x4xf32>, vector<4x256xf32>, vector<8x256xf32> -> vector<8x256xf32>
    %46 = arith.addf %37, %45 : vector<8x256xf32>
    %47 = vector.extract_strided_slice %1 {offsets = [0, 32], sizes = [4, 256], strides = [1, 1]} : vector<4x290xf32> to vector<4x256xf32>
    %c0_32 = arith.constant 0 : index
    %c0_33 = arith.constant 0 : index
    %c0_34 = arith.constant 0 : index
    %48 = vector.load %arg3[%c0_32, %c0_33, %c0_34] : memref<3x1x256xf32, #tpu.memory_space<vmem>>, vector<1x1x256xf32>
    %49 = vector.shape_cast %48 : vector<1x1x256xf32> to vector<1x256xf32>
    %50 = vector.broadcast %49 : vector<1x256xf32> to vector<4x256xf32>
    %51 = arith.mulf %47, %50 : vector<4x256xf32>
    %c6 = arith.constant 6 : index
    %c0_35 = arith.constant 0 : index
    %c0_36 = arith.constant 0 : index
    %52 = vector.load %arg2[%c6, %c0_35, %c0_36] : memref<9x8x4xf32, #tpu.memory_space<vmem>>, vector<1x8x4xf32>
    %53 = vector.shape_cast %52 : vector<1x8x4xf32> to vector<8x4xf32>
    %cst_37 = arith.constant dense<0.000000e+00> : vector<8x256xf32>
    %54 = tpu.matmul %53, %51, %cst_37 {dimension_numbers = #tpu.dot_dimension_numbers<[1], [0], [0], [1], [0, 0, 1, 1], [], []>} : vector<8x4xf32>, vector<4x256xf32>, vector<8x256xf32> -> vector<8x256xf32>
    %55 = arith.addf %46, %54 : vector<8x256xf32>
    %56 = vector.extract_strided_slice %1 {offsets = [0, 33], sizes = [4, 256], strides = [1, 1]} : vector<4x290xf32> to vector<4x256xf32>
    %c7 = arith.constant 7 : index
    %c0_38 = arith.constant 0 : index
    %c0_39 = arith.constant 0 : index
    %57 = vector.load %arg2[%c7, %c0_38, %c0_39] : memref<9x8x4xf32, #tpu.memory_space<vmem>>, vector<1x8x4xf32>
    %58 = vector.shape_cast %57 : vector<1x8x4xf32> to vector<8x4xf32>
    %cst_40 = arith.constant dense<0.000000e+00> : vector<8x256xf32>
    %59 = tpu.matmul %58, %56, %cst_40 {dimension_numbers = #tpu.dot_dimension_numbers<[1], [0], [0], [1], [0, 0, 1, 1], [], []>} : vector<8x4xf32>, vector<4x256xf32>, vector<8x256xf32> -> vector<8x256xf32>
    %60 = arith.addf %55, %59 : vector<8x256xf32>
    %61 = vector.extract_strided_slice %1 {offsets = [0, 34], sizes = [4, 256], strides = [1, 1]} : vector<4x290xf32> to vector<4x256xf32>
    %c2_41 = arith.constant 2 : index
    %c0_42 = arith.constant 0 : index
    %c0_43 = arith.constant 0 : index
    %62 = vector.load %arg3[%c2_41, %c0_42, %c0_43] : memref<3x1x256xf32, #tpu.memory_space<vmem>>, vector<1x1x256xf32>
    %63 = vector.shape_cast %62 : vector<1x1x256xf32> to vector<1x256xf32>
    %64 = vector.broadcast %63 : vector<1x256xf32> to vector<4x256xf32>
    %65 = arith.mulf %61, %64 : vector<4x256xf32>
    %c8 = arith.constant 8 : index
    %c0_44 = arith.constant 0 : index
    %c0_45 = arith.constant 0 : index
    %66 = vector.load %arg2[%c8, %c0_44, %c0_45] : memref<9x8x4xf32, #tpu.memory_space<vmem>>, vector<1x8x4xf32>
    %67 = vector.shape_cast %66 : vector<1x8x4xf32> to vector<8x4xf32>
    %cst_46 = arith.constant dense<0.000000e+00> : vector<8x256xf32>
    %68 = tpu.matmul %67, %65, %cst_46 {dimension_numbers = #tpu.dot_dimension_numbers<[1], [0], [0], [1], [0, 0, 1, 1], [], []>} : vector<8x4xf32>, vector<4x256xf32>, vector<8x256xf32> -> vector<8x256xf32>
    %69 = arith.addf %60, %68 : vector<8x256xf32>
    %cst_47 = arith.constant dense<0.000000e+00> : vector<8xf32>
    %70 = vector.multi_reduction <add>, %69, %cst_47 [1] : vector<8x256xf32> to vector<8xf32>
    %71 = vector.shape_cast %70 : vector<8xf32> to vector<8x1xf32>
    %cst_48 = arith.constant 3.906250e-03 : f32
    %72 = vector.broadcast %cst_48 : f32 to vector<8x1xf32>
    %73 = arith.mulf %71, %72 : vector<8x1xf32>
    %74 = vector.broadcast %73 : vector<8x1xf32> to vector<8x256xf32>
    %75 = arith.subf %69, %74 : vector<8x256xf32>
    %76 = arith.mulf %75, %75 : vector<8x256xf32>
    %cst_49 = arith.constant dense<0.000000e+00> : vector<8xf32>
    %77 = vector.multi_reduction <add>, %76, %cst_49 [1] : vector<8x256xf32> to vector<8xf32>
    %78 = vector.shape_cast %77 : vector<8xf32> to vector<8x1xf32>
    %79 = vector.shape_cast %73 : vector<8x1xf32> to vector<1x8x1xf32>
    %c0_50 = arith.constant 0 : index
    %c0_51 = arith.constant 0 : index
    %c0_52 = arith.constant 0 : index
    %80 = vector.load %arg4[%c0_50, %c0_51, %c0_52] : memref<1x8x1xf32, #tpu.memory_space<vmem>>, vector<1x8x1xf32>
    tpu.vector_store %arg4[%c0_50, %c0_51, %c0_52], %79 {strides = array<i32>} : memref<1x8x1xf32, #tpu.memory_space<vmem>>, vector<1x8x1xf32>,
    %81 = vector.shape_cast %78 : vector<8x1xf32> to vector<1x8x1xf32>
    %c0_53 = arith.constant 0 : index
    %c0_54 = arith.constant 0 : index
    %c0_55 = arith.constant 0 : index
    %82 = vector.load %arg5[%c0_53, %c0_54, %c0_55] : memref<1x8x1xf32, #tpu.memory_space<vmem>>, vector<1x8x1xf32>
    tpu.vector_store %arg5[%c0_53, %c0_54, %c0_55], %81 {strides = array<i32>} : memref<1x8x1xf32, #tpu.memory_space<vmem>>, vector<1x8x1xf32>,
    return
  }
  func.func @transform_0(%arg0: i32) -> (i32, i32, i32) {
    %c0_i32 = arith.constant 0 : i32
    %c0_i32_0 = arith.constant 0 : i32
    %c0_i32_1 = arith.constant 0 : i32
    return %arg0, %c0_i32, %c0_i32_0 : i32, i32, i32
  }
  func.func @transform_1(%arg0: i32) -> (i32, i32, i32) {
    %c0_i32 = arith.constant 0 : i32
    %c0_i32_0 = arith.constant 0 : i32
    %c0_i32_1 = arith.constant 0 : i32
    %c0_i32_2 = arith.constant 0 : i32
    return %c0_i32, %c0_i32_0, %c0_i32_1 : i32, i32, i32
  }
  func.func @transform_2(%arg0: i32) -> (i32, i32, i32) {
    %c0_i32 = arith.constant 0 : i32
    %c0_i32_0 = arith.constant 0 : i32
    %c0_i32_1 = arith.constant 0 : i32
    %c0_i32_2 = arith.constant 0 : i32
    return %c0_i32, %c0_i32_0, %c0_i32_1 : i32, i32, i32
  }
  func.func @transform_3(%arg0: i32) -> (i32, i32, i32) {
    %c0_i32 = arith.constant 0 : i32
    %c0_i32_0 = arith.constant 0 : i32
    %c0_i32_1 = arith.constant 0 : i32
    return %arg0, %c0_i32, %c0_i32_0 : i32, i32, i32
  }
  func.func @transform_4(%arg0: i32) -> (i32, i32, i32) {
    %c0_i32 = arith.constant 0 : i32
    %c0_i32_0 = arith.constant 0 : i32
    %c0_i32_1 = arith.constant 0 : i32
    return %arg0, %c0_i32, %c0_i32_0 : i32, i32, i32
  }
}

module attributes {stable_mosaic.version = 11 : i64} {
  func.func @_conv_bn_lrelu_kernel(%arg0: i32, %arg1: memref<1x4x290xf32, #tpu.memory_space<vmem>>, %arg2: memref<9x8x4xf32, #tpu.memory_space<vmem>>, %arg3: memref<3x1x256xf32, #tpu.memory_space<vmem>>, %arg4: memref<8x1xf32, #tpu.memory_space<vmem>>, %arg5: memref<8x1xf32, #tpu.memory_space<vmem>>, %arg6: memref<1x8x256xf32, #tpu.memory_space<vmem>>) attributes {dimension_semantics = [#tpu.dimension_semantics<parallel>], iteration_bounds = array<i64: 2>, scalar_prefetch = 0 : i64, scratch_operands = 0 : i64, tpu.core_type = #tpu.core_type<tc>, window_params = [{transform_indices = @transform_0, window_bounds = array<i64: 1, 4, 290>}, {pipeline_mode = #tpu.pipeline_mode<synchronous>, transform_indices = @transform_1, window_bounds = array<i64: 9, 8, 4>}, {pipeline_mode = #tpu.pipeline_mode<synchronous>, transform_indices = @transform_2, window_bounds = array<i64: 3, 1, 256>}, {pipeline_mode = #tpu.pipeline_mode<synchronous>, transform_indices = @transform_3, window_bounds = array<i64: 8, 1>}, {pipeline_mode = #tpu.pipeline_mode<synchronous>, transform_indices = @transform_4, window_bounds = array<i64: 8, 1>}, {transform_indices = @transform_5, window_bounds = array<i64: 1, 8, 256>}]} {
    %c0 = arith.constant 0 : index
    %c0_0 = arith.constant 0 : index
    %c0_1 = arith.constant 0 : index
    %0 = vector.load %arg1[%c0, %c0_0, %c0_1] : memref<1x4x290xf32, #tpu.memory_space<vmem>>, vector<1x4x290xf32>
    %1 = vector.shape_cast %0 : vector<1x4x290xf32> to vector<4x290xf32>
    %2 = vector.extract_strided_slice %1 {offsets = [0, 0], sizes = [4, 256], strides = [1, 1]} : vector<4x290xf32> to vector<4x256xf32>
    %c0_2 = arith.constant 0 : index
    %c0_3 = arith.constant 0 : index
    %c0_4 = arith.constant 0 : index
    %3 = vector.load %arg3[%c0_2, %c0_3, %c0_4] : memref<3x1x256xf32, #tpu.memory_space<vmem>>, vector<1x1x256xf32>
    %4 = vector.shape_cast %3 : vector<1x1x256xf32> to vector<1x256xf32>
    %5 = vector.broadcast %4 : vector<1x256xf32> to vector<4x256xf32>
    %6 = arith.mulf %2, %5 : vector<4x256xf32>
    %c0_5 = arith.constant 0 : index
    %c0_6 = arith.constant 0 : index
    %c0_7 = arith.constant 0 : index
    %7 = vector.load %arg2[%c0_5, %c0_6, %c0_7] : memref<9x8x4xf32, #tpu.memory_space<vmem>>, vector<1x8x4xf32>
    %8 = vector.shape_cast %7 : vector<1x8x4xf32> to vector<8x4xf32>
    %cst = arith.constant dense<0.000000e+00> : vector<8x256xf32>
    %9 = tpu.matmul %8, %6, %cst {dimension_numbers = #tpu.dot_dimension_numbers<[1], [0], [0], [1], [0, 0, 1, 1], [], []>} : vector<8x4xf32>, vector<4x256xf32>, vector<8x256xf32> -> vector<8x256xf32>
    %10 = vector.extract_strided_slice %1 {offsets = [0, 1], sizes = [4, 256], strides = [1, 1]} : vector<4x290xf32> to vector<4x256xf32>
    %c1 = arith.constant 1 : index
    %c0_8 = arith.constant 0 : index
    %c0_9 = arith.constant 0 : index
    %11 = vector.load %arg2[%c1, %c0_8, %c0_9] : memref<9x8x4xf32, #tpu.memory_space<vmem>>, vector<1x8x4xf32>
    %12 = vector.shape_cast %11 : vector<1x8x4xf32> to vector<8x4xf32>
    %cst_10 = arith.constant dense<0.000000e+00> : vector<8x256xf32>
    %13 = tpu.matmul %12, %10, %cst_10 {dimension_numbers = #tpu.dot_dimension_numbers<[1], [0], [0], [1], [0, 0, 1, 1], [], []>} : vector<8x4xf32>, vector<4x256xf32>, vector<8x256xf32> -> vector<8x256xf32>
    %14 = arith.addf %9, %13 : vector<8x256xf32>
    %15 = vector.extract_strided_slice %1 {offsets = [0, 2], sizes = [4, 256], strides = [1, 1]} : vector<4x290xf32> to vector<4x256xf32>
    %c2 = arith.constant 2 : index
    %c0_11 = arith.constant 0 : index
    %c0_12 = arith.constant 0 : index
    %16 = vector.load %arg3[%c2, %c0_11, %c0_12] : memref<3x1x256xf32, #tpu.memory_space<vmem>>, vector<1x1x256xf32>
    %17 = vector.shape_cast %16 : vector<1x1x256xf32> to vector<1x256xf32>
    %18 = vector.broadcast %17 : vector<1x256xf32> to vector<4x256xf32>
    %19 = arith.mulf %15, %18 : vector<4x256xf32>
    %c2_13 = arith.constant 2 : index
    %c0_14 = arith.constant 0 : index
    %c0_15 = arith.constant 0 : index
    %20 = vector.load %arg2[%c2_13, %c0_14, %c0_15] : memref<9x8x4xf32, #tpu.memory_space<vmem>>, vector<1x8x4xf32>
    %21 = vector.shape_cast %20 : vector<1x8x4xf32> to vector<8x4xf32>
    %cst_16 = arith.constant dense<0.000000e+00> : vector<8x256xf32>
    %22 = tpu.matmul %21, %19, %cst_16 {dimension_numbers = #tpu.dot_dimension_numbers<[1], [0], [0], [1], [0, 0, 1, 1], [], []>} : vector<8x4xf32>, vector<4x256xf32>, vector<8x256xf32> -> vector<8x256xf32>
    %23 = arith.addf %14, %22 : vector<8x256xf32>
    %24 = vector.extract_strided_slice %1 {offsets = [0, 16], sizes = [4, 256], strides = [1, 1]} : vector<4x290xf32> to vector<4x256xf32>
    %c0_17 = arith.constant 0 : index
    %c0_18 = arith.constant 0 : index
    %c0_19 = arith.constant 0 : index
    %25 = vector.load %arg3[%c0_17, %c0_18, %c0_19] : memref<3x1x256xf32, #tpu.memory_space<vmem>>, vector<1x1x256xf32>
    %26 = vector.shape_cast %25 : vector<1x1x256xf32> to vector<1x256xf32>
    %27 = vector.broadcast %26 : vector<1x256xf32> to vector<4x256xf32>
    %28 = arith.mulf %24, %27 : vector<4x256xf32>
    %c3 = arith.constant 3 : index
    %c0_20 = arith.constant 0 : index
    %c0_21 = arith.constant 0 : index
    %29 = vector.load %arg2[%c3, %c0_20, %c0_21] : memref<9x8x4xf32, #tpu.memory_space<vmem>>, vector<1x8x4xf32>
    %30 = vector.shape_cast %29 : vector<1x8x4xf32> to vector<8x4xf32>
    %cst_22 = arith.constant dense<0.000000e+00> : vector<8x256xf32>
    %31 = tpu.matmul %30, %28, %cst_22 {dimension_numbers = #tpu.dot_dimension_numbers<[1], [0], [0], [1], [0, 0, 1, 1], [], []>} : vector<8x4xf32>, vector<4x256xf32>, vector<8x256xf32> -> vector<8x256xf32>
    %32 = arith.addf %23, %31 : vector<8x256xf32>
    %33 = vector.extract_strided_slice %1 {offsets = [0, 17], sizes = [4, 256], strides = [1, 1]} : vector<4x290xf32> to vector<4x256xf32>
    %c4 = arith.constant 4 : index
    %c0_23 = arith.constant 0 : index
    %c0_24 = arith.constant 0 : index
    %34 = vector.load %arg2[%c4, %c0_23, %c0_24] : memref<9x8x4xf32, #tpu.memory_space<vmem>>, vector<1x8x4xf32>
    %35 = vector.shape_cast %34 : vector<1x8x4xf32> to vector<8x4xf32>
    %cst_25 = arith.constant dense<0.000000e+00> : vector<8x256xf32>
    %36 = tpu.matmul %35, %33, %cst_25 {dimension_numbers = #tpu.dot_dimension_numbers<[1], [0], [0], [1], [0, 0, 1, 1], [], []>} : vector<8x4xf32>, vector<4x256xf32>, vector<8x256xf32> -> vector<8x256xf32>
    %37 = arith.addf %32, %36 : vector<8x256xf32>
    %38 = vector.extract_strided_slice %1 {offsets = [0, 18], sizes = [4, 256], strides = [1, 1]} : vector<4x290xf32> to vector<4x256xf32>
    %c2_26 = arith.constant 2 : index
    %c0_27 = arith.constant 0 : index
    %c0_28 = arith.constant 0 : index
    %39 = vector.load %arg3[%c2_26, %c0_27, %c0_28] : memref<3x1x256xf32, #tpu.memory_space<vmem>>, vector<1x1x256xf32>
    %40 = vector.shape_cast %39 : vector<1x1x256xf32> to vector<1x256xf32>
    %41 = vector.broadcast %40 : vector<1x256xf32> to vector<4x256xf32>
    %42 = arith.mulf %38, %41 : vector<4x256xf32>
    %c5 = arith.constant 5 : index
    %c0_29 = arith.constant 0 : index
    %c0_30 = arith.constant 0 : index
    %43 = vector.load %arg2[%c5, %c0_29, %c0_30] : memref<9x8x4xf32, #tpu.memory_space<vmem>>, vector<1x8x4xf32>
    %44 = vector.shape_cast %43 : vector<1x8x4xf32> to vector<8x4xf32>
    %cst_31 = arith.constant dense<0.000000e+00> : vector<8x256xf32>
    %45 = tpu.matmul %44, %42, %cst_31 {dimension_numbers = #tpu.dot_dimension_numbers<[1], [0], [0], [1], [0, 0, 1, 1], [], []>} : vector<8x4xf32>, vector<4x256xf32>, vector<8x256xf32> -> vector<8x256xf32>
    %46 = arith.addf %37, %45 : vector<8x256xf32>
    %47 = vector.extract_strided_slice %1 {offsets = [0, 32], sizes = [4, 256], strides = [1, 1]} : vector<4x290xf32> to vector<4x256xf32>
    %c0_32 = arith.constant 0 : index
    %c0_33 = arith.constant 0 : index
    %c0_34 = arith.constant 0 : index
    %48 = vector.load %arg3[%c0_32, %c0_33, %c0_34] : memref<3x1x256xf32, #tpu.memory_space<vmem>>, vector<1x1x256xf32>
    %49 = vector.shape_cast %48 : vector<1x1x256xf32> to vector<1x256xf32>
    %50 = vector.broadcast %49 : vector<1x256xf32> to vector<4x256xf32>
    %51 = arith.mulf %47, %50 : vector<4x256xf32>
    %c6 = arith.constant 6 : index
    %c0_35 = arith.constant 0 : index
    %c0_36 = arith.constant 0 : index
    %52 = vector.load %arg2[%c6, %c0_35, %c0_36] : memref<9x8x4xf32, #tpu.memory_space<vmem>>, vector<1x8x4xf32>
    %53 = vector.shape_cast %52 : vector<1x8x4xf32> to vector<8x4xf32>
    %cst_37 = arith.constant dense<0.000000e+00> : vector<8x256xf32>
    %54 = tpu.matmul %53, %51, %cst_37 {dimension_numbers = #tpu.dot_dimension_numbers<[1], [0], [0], [1], [0, 0, 1, 1], [], []>} : vector<8x4xf32>, vector<4x256xf32>, vector<8x256xf32> -> vector<8x256xf32>
    %55 = arith.addf %46, %54 : vector<8x256xf32>
    %56 = vector.extract_strided_slice %1 {offsets = [0, 33], sizes = [4, 256], strides = [1, 1]} : vector<4x290xf32> to vector<4x256xf32>
    %c7 = arith.constant 7 : index
    %c0_38 = arith.constant 0 : index
    %c0_39 = arith.constant 0 : index
    %57 = vector.load %arg2[%c7, %c0_38, %c0_39] : memref<9x8x4xf32, #tpu.memory_space<vmem>>, vector<1x8x4xf32>
    %58 = vector.shape_cast %57 : vector<1x8x4xf32> to vector<8x4xf32>
    %cst_40 = arith.constant dense<0.000000e+00> : vector<8x256xf32>
    %59 = tpu.matmul %58, %56, %cst_40 {dimension_numbers = #tpu.dot_dimension_numbers<[1], [0], [0], [1], [0, 0, 1, 1], [], []>} : vector<8x4xf32>, vector<4x256xf32>, vector<8x256xf32> -> vector<8x256xf32>
    %60 = arith.addf %55, %59 : vector<8x256xf32>
    %61 = vector.extract_strided_slice %1 {offsets = [0, 34], sizes = [4, 256], strides = [1, 1]} : vector<4x290xf32> to vector<4x256xf32>
    %c2_41 = arith.constant 2 : index
    %c0_42 = arith.constant 0 : index
    %c0_43 = arith.constant 0 : index
    %62 = vector.load %arg3[%c2_41, %c0_42, %c0_43] : memref<3x1x256xf32, #tpu.memory_space<vmem>>, vector<1x1x256xf32>
    %63 = vector.shape_cast %62 : vector<1x1x256xf32> to vector<1x256xf32>
    %64 = vector.broadcast %63 : vector<1x256xf32> to vector<4x256xf32>
    %65 = arith.mulf %61, %64 : vector<4x256xf32>
    %c8 = arith.constant 8 : index
    %c0_44 = arith.constant 0 : index
    %c0_45 = arith.constant 0 : index
    %66 = vector.load %arg2[%c8, %c0_44, %c0_45] : memref<9x8x4xf32, #tpu.memory_space<vmem>>, vector<1x8x4xf32>
    %67 = vector.shape_cast %66 : vector<1x8x4xf32> to vector<8x4xf32>
    %cst_46 = arith.constant dense<0.000000e+00> : vector<8x256xf32>
    %68 = tpu.matmul %67, %65, %cst_46 {dimension_numbers = #tpu.dot_dimension_numbers<[1], [0], [0], [1], [0, 0, 1, 1], [], []>} : vector<8x4xf32>, vector<4x256xf32>, vector<8x256xf32> -> vector<8x256xf32>
    %69 = arith.addf %60, %68 : vector<8x256xf32>
    %c0_47 = arith.constant 0 : index
    %c0_48 = arith.constant 0 : index
    %70 = vector.load %arg4[%c0_47, %c0_48] : memref<8x1xf32, #tpu.memory_space<vmem>>, vector<8x1xf32>
    %71 = vector.broadcast %70 : vector<8x1xf32> to vector<8x256xf32>
    %72 = arith.mulf %69, %71 : vector<8x256xf32>
    %c0_49 = arith.constant 0 : index
    %c0_50 = arith.constant 0 : index
    %73 = vector.load %arg5[%c0_49, %c0_50] : memref<8x1xf32, #tpu.memory_space<vmem>>, vector<8x1xf32>
    %74 = vector.broadcast %73 : vector<8x1xf32> to vector<8x256xf32>
    %75 = arith.addf %72, %74 : vector<8x256xf32>
    %cst_51 = arith.constant 0.000000e+00 : f32
    %76 = vector.broadcast %cst_51 : f32 to vector<8x256xf32>
    %77 = arith.cmpf ogt, %75, %76 : vector<8x256xf32>
    %cst_52 = arith.constant 1.000000e-01 : f32
    %78 = vector.broadcast %cst_52 : f32 to vector<8x256xf32>
    %79 = arith.mulf %78, %75 : vector<8x256xf32>
    %80 = arith.select %77, %75, %79 : vector<8x256xi1>, vector<8x256xf32>
    %81 = vector.shape_cast %80 : vector<8x256xf32> to vector<1x8x256xf32>
    %c0_53 = arith.constant 0 : index
    %c0_54 = arith.constant 0 : index
    %c0_55 = arith.constant 0 : index
    %82 = vector.load %arg6[%c0_53, %c0_54, %c0_55] : memref<1x8x256xf32, #tpu.memory_space<vmem>>, vector<1x8x256xf32>
    tpu.vector_store %arg6[%c0_53, %c0_54, %c0_55], %81 {strides = array<i32>} : memref<1x8x256xf32, #tpu.memory_space<vmem>>, vector<1x8x256xf32>,
    return
  }
  func.func @transform_0(%arg0: i32) -> (i32, i32, i32) {
    %c0_i32 = arith.constant 0 : i32
    %c0_i32_0 = arith.constant 0 : i32
    %c0_i32_1 = arith.constant 0 : i32
    return %arg0, %c0_i32, %c0_i32_0 : i32, i32, i32
  }
  func.func @transform_1(%arg0: i32) -> (i32, i32, i32) {
    %c0_i32 = arith.constant 0 : i32
    %c0_i32_0 = arith.constant 0 : i32
    %c0_i32_1 = arith.constant 0 : i32
    %c0_i32_2 = arith.constant 0 : i32
    return %c0_i32, %c0_i32_0, %c0_i32_1 : i32, i32, i32
  }
  func.func @transform_2(%arg0: i32) -> (i32, i32, i32) {
    %c0_i32 = arith.constant 0 : i32
    %c0_i32_0 = arith.constant 0 : i32
    %c0_i32_1 = arith.constant 0 : i32
    %c0_i32_2 = arith.constant 0 : i32
    return %c0_i32, %c0_i32_0, %c0_i32_1 : i32, i32, i32
  }
  func.func @transform_3(%arg0: i32) -> (i32, i32) {
    %c0_i32 = arith.constant 0 : i32
    %c0_i32_0 = arith.constant 0 : i32
    %c0_i32_1 = arith.constant 0 : i32
    return %c0_i32, %c0_i32_0 : i32, i32
  }
  func.func @transform_4(%arg0: i32) -> (i32, i32) {
    %c0_i32 = arith.constant 0 : i32
    %c0_i32_0 = arith.constant 0 : i32
    %c0_i32_1 = arith.constant 0 : i32
    return %c0_i32, %c0_i32_0 : i32, i32
  }
  func.func @transform_5(%arg0: i32) -> (i32, i32, i32) {
    %c0_i32 = arith.constant 0 : i32
    %c0_i32_0 = arith.constant 0 : i32
    %c0_i32_1 = arith.constant 0 : i32
    return %arg0, %c0_i32, %c0_i32_0 : i32, i32, i32
  }
}

</mosaic_0001>

<bundles_post_ra>
// kernel: cnnblock_forward.2
= control target key start
LH: loop header
LB: loop body
LE: loop exit
PB: predicated region body
PF: predicated region fallthrough
CT: control target
= control target key end

     0   :  { %s1337_s15 = smov 0   ;;  %s1471_s0 = inlined_call_operand.vmem [shape: f32[2,4,290], index: 0, kind: input, shape index: {}]   ;;  %s1472_s1 = inlined_call_operand.vmem [shape: f32[9,8,4], index: 1, kind: input, shape index: {}]   ;;  %s1473_s2 = inlined_call_operand.vmem [shape: f32[3,1,256], index: 2, kind: input, shape index: {}]   ;;  %s1474_s3 = inlined_call_operand.vmem [shape: f32[2,8,1], index: 3, kind: output, shape index: {0}]   ;;  %s1475_s4 = inlined_call_operand.vmem [shape: f32[2,8,1], index: 4, kind: output, shape index: {1}]  }
   0x1 LB: > { %s1204_s16 = sadd.s32 4294967295, %s1296_s15   ;;  %p1208_p0 = scmp.ge.s32.totalorder %s1296_s15, 1  ;;  %s1296_s15 = sphi %s1337_s15, %s15_s15  }
   0x2   : > { %p165_p1 = scmp.lt.s32.totalorder %s1296_s15, 3 }
   0x4   : > { %p166_p2 = pnand %p1208_p0, %p165_p1 }
   0x5   : > { %v211_v0 = vlaneseq (!%p166_p2)  ;;  %p194_p3 = scmp.lt.s32.totalorder (!%p166_p2), %s1204_s16, 1  ;;  %v1219_v2 = vld [vmem:[%s1473_s2 + $0x4] sm:$0x3] (!%p166_p2)  ;;  %v209_v3 = vld [vmem:[%s1473_s2] sm:$0x3] (!%p166_p2)  ;;  %s1298_s25 = smov (!%p166_p2), 18  }
   0x6   : > { %169 = sbr.rel (%p166_p2) target bundleno = 798 (0x31e), region = 32  ;;  %s1299_s26 = smov (!%p166_p2), 2   ;;  %v1305_v15 = vmov (!%p166_p2), 0.0   ;;  %vm709_vm0 = vcmask (!%p166_p2), 146432   ;;  %vm812_vm1 = vcmask (!%p166_p2), 261120   ;;  %vm623_vm2 = vcmask (!%p166_p2), 908288  }
   0x7   : > { %v212_v1 = vshrl.u32 (!%p166_p2), %v211_v0, 7  ;;  %s1300_s27 = smov (!%p166_p2), 32   ;;  %s1301_s28 = smov (!%p166_p2), 16   ;;  %697 = vmatprep.mubr.f32.mxu0 (!%p166_p2), %v1305_v15  ;;  %310 = vmatprep.mubr.f32.mxu1 (!%p166_p2), %v1305_v15  ;;  %vm241_vm3 = vcmask (!%p166_p2), 1043456   ;;  %vm412_vm4 = vcmask (!%p166_p2), 15360   ;;  %vm237_vm5 = vcmask (!%p166_p2), 31744  }
   0x8   : > { %s1302_s29 = smov (!%p166_p2), 34   ;;  %s1303_s30 = smov (!%p166_p2), 111   ;;  %v1228_v36 = vld [vmem:[%s1472_s1 + $0x20] sm:$0xff] (!%p166_p2)  ;;  %vm234_vm6 = vcmask (!%p166_p2), 1039360   ;;  %vm515_vm7 = vcmask (!%p166_p2), 130048   ;;  %vm1006_vm8 = vcmask (!%p166_p2), 277504  }
   0x9   : > { %v213_v4 = vsub.s32 (!%p166_p2), 0, %v212_v1  ;;  %v217_v5 = vsub.s32 (!%p166_p2), 1, %v212_v1  ;;  %s1304_s5 = smov (!%p166_p2), 127   ;;  %s1306_s6 = smov (!%p166_p2), 110   ;;  %v1212_v50 = vld [vmem:[%s1472_s1 + $0x8] sm:$0xff] (!%p166_p2)  ;;  %v222_v57 = vld [vmem:[%s1472_s1] sm:$0xff] (!%p166_p2) }
   0xa   : > { %s1307_s7 = smov (!%p166_p2), 96   ;;  %s1308_s10 = smov (!%p166_p2), 95   ;;  %vm726_vm9 = vcmask (!%p166_p2), 900096   ;;  %vm829_vm10 = vcmask (!%p166_p2), 785408   ;;  %vm429_vm11 = vcmask (!%p166_p2), 1031168   ;;  %vm920_vm12 = vcmask (!%p166_p2), 777216  }
   0xb   : > { %v403_v6 = vrot.slane (!%p166_p2), %v1219_v2, %v213_v4  ;;  %v407_v7 = vrot.slane (!%p166_p2), %v1219_v2, %v217_v5  ;;  %v214_v8 = vrot.slane (!%p166_p2), %v209_v3, %v213_v4  ;;  %v218_v9 = vrot.slane (!%p166_p2), %v209_v3, %v217_v5  ;;  %s1309_s11 = smov (!%p166_p2), 126   ;;  %s1310_s18 = smov (!%p166_p2), 112   ;;  %v1232_v4 = vld [vmem:[%s1472_s1 + $0x28] sm:$0xff] (!%p166_p2) }
   0xc   : > { %s1311_s19 = smov (!%p166_p2), 94   ;;  %vm532_vm13 = vcmask (!%p166_p2), 916480   ;;  %vm1023_vm14 = vcmask (!%p166_p2), 769024   ;;  %vm1117_vm15 = vcmask (!%p166_p2), 7168  }
   0xd   : > { %s1477_s16 = smov (!%p194_p3, %s1204_s16), 1  ;;  %v408_v10 = vcombine.low %v403_v6, %v407_v7  ;;  %v219_v11 = vcombine.low %v214_v8, %v218_v9 }
   0xe   : > { %s1266_s21 = smul.u32 12, %s1477_s16 }
   0xf   : > { %706 = vrot.lane.b32.xlu0 %v408_v10, %s1298_s25  ;;  %409 = vrot.lane.b32.xlu1 %v408_v10, %s1299_s26 }
  0x10   : > { %s198_s24 = scalar_lea.vmem %s1471_s0, %s1266_s21 }
  0x11   : > { %v1357_v12 = vld [vmem:[%s198_s24] sm:$0xff]  ;;  %v1361_v14 = vld [vmem:[%s198_s24 + $0x8] sm:$0xf] }
  0x12   : > { %v227_v13 = vcombine.high %v1357_v12, %v1357_v12  ;;  %v221_v39 = vmul.f32 %v219_v11, %v1357_v12 }
  0x13   : > { %809 = vrot.lane.b32.xlu0 %v219_v11, %s1300_s27  ;;  %512 = vrot.lane.b32.xlu1 %v219_v11, %s1301_s28  ;;  %v1236_v11 = vld [vmem:[%s1472_s1 + $0x30] sm:$0xff] }
  0x14   : > { %v318_v47 = vcombine.high %v221_v39, %v221_v39 }
  0x17   : > { %1003 = vrot.lane.b32.xlu0 %v408_v10, %s1302_s29  ;;  %619 = vrot.lane.b32.xlu1 %v227_v13, %s1303_s30 }
  0x1b   : > { %621 = vrot.lane.b32.xlu0 %v1361_v14, %s1303_s30  ;;  %617 = vrot.lane.b32.xlu1 %v1357_v12, %s1303_s30 }
  0x1f   : > { %230 = vrot.lane.b32.xlu0 %v227_v13, %s1304_s5  ;;  %232 = vrot.lane.b32.xlu1 %v1361_v14, %s1304_s5 }
  0x23   : > { %228 = vrot.lane.b32.xlu0 %v1357_v12, %s1304_s5 }
  0x81   : > { %v707_v16 = vpop.permute.xlu0 %706  ;;  %v410_v17 = vpop.permute.xlu1 %409 }
  0x82   : > { %v708_v18 = vrot.slane %v707_v16, 4  ;;  %v411_v30 = vrot.slane %v410_v17, 4 }
  0x84   : > { %v714_v19 = vmul.f32 %v708_v18, %v1361_v14  ;;  %v710_v22 = vsel %vm709_vm0, %v708_v18, %v707_v16  ;;  %v417_v37 = vmul.f32 %v411_v30, %v1361_v14  ;;  %v413_v40 = vsel %vm412_vm4, %v411_v30, %v410_v17  ;;  %v1220_v17 = vld [vmem:[%s1472_s1 + $0x10] sm:$0xff] }
  0x85   : > { %v810_v20 = vpop.permute.xlu0 %809  ;;  %v1370_v21 = vpop.permute.xlu1 %512  ;;  %v713_v26 = vmul.f32 %v710_v22, %v1357_v12  ;;  %v416_v46 = vmul.f32 %v413_v40, %v1357_v12  ;;  %v1240_v22 = vld [vmem:[%s1472_s1 + $0x38] sm:$0xff] }
  0x86   : > { %v811_v23 = vrot.slane %v810_v20, 4  ;;  %724 = vrot.lane.b32.xlu1 %v714_v19, %s1306_s6  ;;  %v514_v38 = vrot.slane %v1370_v21, 4 }
  0x87   : > { %v719_v31 = vcombine.high %v713_v26, %v713_v26  ;;  %v422_v54 = vcombine.high %v416_v46, %v416_v46 }
  0x88   : > { %v813_v24 = vsel %vm812_vm1, %v811_v23, %v810_v20  ;;  %v817_v25 = vmul.f32 %v811_v23, %v1361_v14  ;;  %v516_v44 = vsel %vm515_vm7, %v514_v38, %v1370_v21  ;;  %v520_v59 = vmul.f32 %v514_v38, %v1361_v14 }
  0x89   : > { %v816_v27 = vmul.f32 %v813_v24, %v1357_v12  ;;  %v1375_v28 = vpop.permute.xlu0 %1003  ;;  %v620_v29 = vpop.permute.xlu1 %619  ;;  %v519_v51 = vmul.f32 %v516_v44, %v1357_v12 }
  0x8a   : > { %827 = vrot.lane.b32.xlu1 %v817_v25, %s1307_s7  ;;  %v1005_v45 = vrot.slane %v1375_v28, 4 }
  0x8b   : > { %823 = vrot.lane.b32.xlu0 %v816_v27, %s1307_s7  ;;  %v822_v48 = vcombine.high %v816_v27, %v816_v27  ;;  %v525_v56 = vcombine.high %v519_v51, %v519_v51  ;;  %v1224_v27 = vld [vmem:[%s1472_s1 + $0x18] sm:$0xff] }
  0x8c   : > { %v1007_v53 = vsel %vm1006_vm8, %v1005_v45, %v1375_v28  ;;  %v1011_v60 = vmul.f32 %v1005_v45, %v1361_v14 }
  0x8d   : > { %v622_v32 = vpop.permute.xlu0 %621  ;;  %v618_v33 = vpop.permute.xlu1 %617  ;;  %v1010_v55 = vmul.f32 %v1007_v53, %v1357_v12 }
  0x8e   : > { %720 = vrot.lane.b32.xlu1 %v713_v26, %s1306_s6  ;;  %v625_v34 = vsel %vm623_vm2, %v620_v29, %v622_v32  ;;  %v624_v35 = vsel %vm623_vm2, %v618_v33, %v620_v29 }
  0x8f   : > { %722 = vrot.lane.b32.xlu0 %v719_v31, %s1306_s6  ;;  %1229 = vmatprep.subr.msk.mxu0 %vm241_vm3, %v625_v34  ;;  %v1016_v58 = vcombine.high %v1010_v55, %v1010_v55  ;;  %s1210_s6 = sshll.u32 %s1477_s16, 3 }
  0x90   : > { %1230 = vmatpush1.msk.msra.mxu0 %vm241_vm3, %v624_v35  ;;  %s202_s9 = scalar_lea.vmem %s1474_s3, %s1210_s6  ;;  %s206_s12 = scalar_lea.vmem %s1475_s4, %s1210_s6 }
  0x91   : > { %v231_v41 = vpop.permute.xlu0 %230  ;;  %v233_v42 = vpop.permute.xlu1 %232  ;;  %1231 = vmatmul.mubr.msk.f32.vlgmr.msra.gmra.mrb[0].mxu0 %vm237_vm5, %v1228_v36 }
  0x92   : > { %916 = vrot.lane.b32.xlu1 %v227_v13, %s1308_s10  ;;  %v236_v43 = vsel %vm234_vm6, %v231_v41, %v233_v42  ;;  %800 = vmatprep.mubr.f32.mxu0 %v1305_v15 }
  0x93   : > { %427 = vrot.lane.b32.xlu0 %v417_v37, %s1309_s11  ;;  %1213 = vmatprep.subr.msk.mxu1 %vm241_vm3, %v236_v43 }
  0x95   : > { %v229_v49 = vpop.permute.xlu0 %228 }
  0x96   : > { %423 = vrot.lane.b32.xlu1 %v416_v46, %s1309_s11  ;;  %v235_v52 = vsel %vm234_vm6, %v229_v49, %v231_v41 }
  0x97   : > { %825 = vrot.lane.b32.xlu0 %v822_v48, %s1307_s7  ;;  %1214 = vmatpush1.msk.msra.mxu1 %vm241_vm3, %v235_v52 }
  0x98   : > { %1215 = vmatmul.mubr.msk.f32.vlgmr.msra.gmra.mrb[0].mxu1 %vm237_vm5, %v1212_v50  ;;  %1216 = vmatprep.subr.msk.mxu1 %vm241_vm3, %v318_v47 }
  0x99   : > { %1217 = vmatpush1.msk.msra.mxu1 %vm241_vm3, %v221_v39  ;;  %390 = vmatprep.mubr.f32.mxu1 %v1305_v15 }
  0x9a   : > { %425 = vrot.lane.b32.xlu1 %v422_v54, %s1309_s11 }
  0x9b   : > { %918 = vrot.lane.b32.xlu0 %v1361_v14, %s1308_s10 }
  0x9e   : > { %528 = vrot.lane.b32.xlu1 %v525_v56, %s1310_s18 }
  0x9f   : > { %914 = vrot.lane.b32.xlu0 %v1357_v12, %s1308_s10 }
  0xa0   : > { %1218 = vmatmul.mubr.msk.f32.vlgmr.msra.gmra.mrb[0].mxu1 %vm237_vm5, %v222_v57 }
  0xa1   : > { %503 = vmatprep.mubr.f32.mxu1 %v1305_v15 }
  0xa2   : > { %1019 = vrot.lane.b32.xlu1 %v1016_v58, %s1311_s19 }
  0xa3   : > { %530 = vrot.lane.b32.xlu0 %v520_v59, %s1310_s18 }
  0xa6   : > { %526 = vrot.lane.b32.xlu1 %v519_v51, %s1310_s18 }
  0xa7   : > { %1021 = vrot.lane.b32.xlu0 %v1011_v60, %s1311_s19 }
  0xab   : > { %1017 = vrot.lane.b32.xlu0 %v1010_v55, %s1311_s19 }
  0xf8   : > { %v725_v61 = vpop.permute.xlu1 %724 }
  0xfc   : > { %v828_v62 = vpop.permute.xlu1 %827 }
  0xfd   : > { %v824_v63 = vpop.permute.xlu0 %823 }
 0x100   : > { %v721_v0 = vpop.permute.xlu1 %720 }
 0x101   : > { %v723_v1 = vpop.permute.xlu0 %722 }
 0x102   : > { %v727_v2 = vsel %vm726_vm9, %v721_v0, %v723_v1  ;;  %v728_v3 = vsel %vm726_vm9, %v723_v1, %v725_v61 }
 0x103   : > { %1233 = vmatprep.subr.msk.mxu0 %vm241_vm3, %v728_v3 }
 0x104   : > { %1234 = vmatpush1.msk.msra.mxu0 %vm241_vm3, %v727_v2  ;;  %v917_v5 = vpop.permute.xlu1 %916 }
 0x105   : > { %v428_v6 = vpop.permute.xlu0 %427  ;;  %1235 = vmatmul.mubr.msk.f32.vlgmr.msra.gmra.mrb[0].mxu0 %vm237_vm5, %v1232_v4 }
 0x106   : > { %903 = vmatprep.mubr.f32.mxu0 %v1305_v15 }
 0x108   : > { %v424_v7 = vpop.permute.xlu1 %423 }
 0x109   : > { %v826_v8 = vpop.permute.xlu0 %825 }
 0x10a   : > { %v830_v9 = vsel %vm829_vm10, %v824_v63, %v826_v8  ;;  %v831_v10 = vsel %vm829_vm10, %v826_v8, %v828_v62 }
 0x10b   : > { %1237 = vmatprep.subr.msk.mxu0 %vm241_vm3, %v831_v10 }
 0x10c   : > { %1238 = vmatpush1.msk.msra.mxu0 %vm241_vm3, %v830_v9  ;;  %v426_v12 = vpop.permute.xlu1 %425 }
 0x10d   : > { %v430_v13 = vsel %vm429_vm11, %v424_v7, %v426_v12  ;;  %v431_v14 = vsel %vm429_vm11, %v426_v12, %v428_v6  ;;  %v919_v16 = vpop.permute.xlu0 %918  ;;  %1239 = vmatmul.mubr.msk.f32.vlgmr.msra.gmra.mrb[0].mxu0 %vm237_vm5, %v1236_v11 }
 0x10e   : > { %v922_v18 = vsel %vm920_vm12, %v917_v5, %v919_v16  ;;  %1221 = vmatprep.subr.msk.mxu1 %vm241_vm3, %v431_v14  ;;  %994 = vmatprep.mubr.f32.mxu0 %v1305_v15 }
 0x10f   : > { %1222 = vmatpush1.msk.msra.mxu1 %vm241_vm3, %v430_v13  ;;  %1241 = vmatprep.subr.msk.mxu0 %vm241_vm3, %v922_v18 }
 0x110   : > { %v529_v19 = vpop.permute.xlu1 %528  ;;  %1223 = vmatmul.mubr.msk.f32.vlgmr.msra.gmra.mrb[0].mxu1 %vm237_vm5, %v1220_v17 }
 0x111   : > { %v915_v20 = vpop.permute.xlu0 %914  ;;  %606 = vmatprep.mubr.f32.mxu1 %v1305_v15 }
 0x112   : > { %v921_v21 = vsel %vm920_vm12, %v915_v20, %v917_v5 }
 0x113   : > { %1242 = vmatpush1.msk.msra.mxu0 %vm241_vm3, %v921_v21 }
 0x114   : > { %v1020_v23 = vpop.permute.xlu1 %1019 }
 0x115   : > { %v531_v24 = vpop.permute.xlu0 %530  ;;  %1243 = vmatmul.mubr.msk.f32.vlgmr.msra.gmra.mrb[0].mxu0 %vm237_vm5, %v1240_v22 }
 0x116   : > { %v534_v25 = vsel %vm532_vm13, %v529_v19, %v531_v24  ;;  %1097 = vmatprep.mubr.f32.mxu0 %v1305_v15  ;;  %v1244_v15 = vld [vmem:[%s1472_s1 + $0x40] sm:$0xff] }
 0x117   : > { %1225 = vmatprep.subr.msk.mxu1 %vm241_vm3, %v534_v25 }
 0x118   : > { %v527_v26 = vpop.permute.xlu1 %526 }
 0x119   : > { %v533_v28 = vsel %vm532_vm13, %v527_v26, %v529_v19  ;;  %v1022_v29 = vpop.permute.xlu0 %1021 }
 0x11a   : > { %v1025_v30 = vsel %vm1023_vm14, %v1020_v23, %v1022_v29  ;;  %1226 = vmatpush1.msk.msra.mxu1 %vm241_vm3, %v533_v28 }
 0x11b   : > { %1227 = vmatmul.mubr.msk.f32.vlgmr.msra.gmra.mrb[0].mxu1 %vm237_vm5, %v1224_v27  ;;  %1245 = vmatprep.subr.msk.mxu0 %vm241_vm3, %v1025_v30 }
 0x11d   : > { %v1018_v31 = vpop.permute.xlu0 %1017 }
 0x11e   : > { %v1024_v32 = vsel %vm1023_vm14, %v1018_v31, %v1020_v23 }
 0x11f   : > { %1246 = vmatpush1.msk.msra.mxu0 %vm241_vm3, %v1024_v32 }
 0x120   : > { %1247 = vmatmul.mubr.msk.f32.vlgmr.msra.gmra.mrb[0].mxu0 %vm237_vm5, %v1244_v15 }
 0x1ee   : > { %v608_v33 = vpop.f32.mrb[0].mxu1 }
 0x1ef   : > { %v610_v34 = vpop.f32.mrb[1].mxu1 }
 0x1f3   : > { %v1099_v35 = vpop.f32.mrb[0].mxu0 }
 0x1f4   : > { %v1250_v36 = vadd.f32 %v1099_v35, %v608_v33  ;;  %v1101_v37 = vpop.f32.mrb[1].mxu0 }
 0x1f5   : > { %v1251_v38 = vadd.f32 %v1101_v37, %v610_v34 }
 0x1f7   : > { %v1106_v39 = vadd.f32 %v1251_v38, %v1250_v36 }
 0x1f9   : > { %1107 = vadd.xlane.f32.xlu1 %v1106_v39 }
 0x286   : > { %v1108_v40 = vpop.xlane.xlu1 %1107 }
 0x287   : > { %v1109_v41 = vmul.f32 0.00390625, %v1108_v40 }
 0x289   : > { %v1110_v42 = vsub.f32 %v1250_v36, %v1109_v41  ;;  %v1111_v43 = vsub.f32 %v1251_v38, %v1109_v41  ;;  %1118 = vst.msk [vmem:[%s202_s9] sm:$0xff] %vm1117_vm15, %v1109_v41 }
 0x28b   : > { %v1112_v44 = vmul.f32 %v1110_v42, %v1110_v42  ;;  %v1113_v45 = vmul.f32 %v1111_v43, %v1111_v43 }
 0x28d   : > { %v1114_v46 = vadd.f32 %v1113_v45, %v1112_v44 }
 0x28f   : > { %1115 = vadd.xlane.f32.xlu0 %v1114_v46 }
 0x31c   : > { %v1116_v47 = vpop.xlane.xlu0 %1115 }
 0x31d   : > { %1119 = vst.msk [vmem:[%s206_s12] sm:$0xff] %vm1117_vm15, %v1116_v47 }
 0x31e PF: > { %s15_s15 = sadd.s32 1, %s1296_s15  }
 0x31f   : > { %p12_p4 = scmp.ge.s32.totalorder %s15_s15, 4  }
 0x321   :  { %14 = sbr.rel (!%p12_p4) target bundleno = 1 (0x1), region = 83 }

// kernel: cnnblock_forward.3
= control target key start
LH: loop header
LB: loop body
LE: loop exit
PB: predicated region body
PF: predicated region fallthrough
CT: control target
= control target key end

     0   :  { %s1346_s18 = smov 0   ;;  %s1483_s0 = inlined_call_operand.vmem [shape: f32[2,4,290], index: 0, kind: input, shape index: {}]   ;;  %s1484_s1 = inlined_call_operand.vmem [shape: f32[9,8,4], index: 1, kind: input, shape index: {}]   ;;  %s1485_s2 = inlined_call_operand.vmem [shape: f32[3,1,256], index: 2, kind: input, shape index: {}]   ;;  %s1486_s3 = inlined_call_operand.vmem [shape: f32[8,1], index: 3, kind: input, shape index: {}]   ;;  %s1487_s4 = inlined_call_operand.vmem [shape: f32[8,1], index: 4, kind: input, shape index: {}]   ;;  %s1488_s5 = inlined_call_operand.vmem [shape: f32[2,8,256], index: 5, kind: output, shape index: {}]  }
   0x1 LB: > { %s1203_s19 = sadd.s32 4294967295, %s1299_s18   ;;  %p1207_p0 = scmp.ge.s32.totalorder %s1299_s18, 1  ;;  %s1299_s18 = sphi %s1346_s18, %s15_s18  }
   0x2   : > { %p187_p1 = scmp.lt.s32.totalorder %s1299_s18, 3 }
   0x4   : > { %p188_p2 = pnand %p1207_p0, %p187_p1 }
   0x5   : > { %v229_v0 = vlaneseq (!%p188_p2)  ;;  %p215_p3 = scmp.lt.s32.totalorder (!%p188_p2), %s1203_s19, 1  ;;  %v1218_v2 = vld [vmem:[%s1485_s2 + $0x4] sm:$0x3] (!%p188_p2)  ;;  %v227_v3 = vld [vmem:[%s1485_s2] sm:$0x3] (!%p188_p2)  ;;  %s1301_s28 = smov (!%p188_p2), 18  }
   0x6   : > { %191 = sbr.rel (%p188_p2) target bundleno = 511 (0x1ff), region = 40  ;;  %s1302_s29 = smov (!%p188_p2), 2   ;;  %v1308_v15 = vmov (!%p188_p2), 0.0   ;;  %vm727_vm0 = vcmask (!%p188_p2), 146432   ;;  %vm830_vm1 = vcmask (!%p188_p2), 261120   ;;  %vm641_vm2 = vcmask (!%p188_p2), 908288  }
   0x7   : > { %v230_v1 = vshrl.u32 (!%p188_p2), %v229_v0, 7  ;;  %s1303_s30 = smov (!%p188_p2), 32   ;;  %s1304_s6 = smov (!%p188_p2), 16   ;;  %715 = vmatprep.mubr.f32.mxu0 (!%p188_p2), %v1308_v15  ;;  %328 = vmatprep.mubr.f32.mxu1 (!%p188_p2), %v1308_v15  ;;  %vm259_vm3 = vcmask (!%p188_p2), 1043456   ;;  %vm430_vm4 = vcmask (!%p188_p2), 15360   ;;  %vm255_vm5 = vcmask (!%p188_p2), 31744  }
   0x8   : > { %s1305_s7 = smov (!%p188_p2), 34   ;;  %s1306_s8 = smov (!%p188_p2), 111   ;;  %v1227_v36 = vld [vmem:[%s1484_s1 + $0x20] sm:$0xff] (!%p188_p2)  ;;  %vm252_vm6 = vcmask (!%p188_p2), 1039360   ;;  %vm533_vm7 = vcmask (!%p188_p2), 130048   ;;  %vm1024_vm8 = vcmask (!%p188_p2), 277504  }
   0x9   : > { %v231_v4 = vsub.s32 (!%p188_p2), 0, %v230_v1  ;;  %v235_v5 = vsub.s32 (!%p188_p2), 1, %v230_v1  ;;  %s1307_s9 = smov (!%p188_p2), 127   ;;  %s1309_s10 = smov (!%p188_p2), 110   ;;  %v1211_v50 = vld [vmem:[%s1484_s1 + $0x8] sm:$0xff] (!%p188_p2)  ;;  %v240_v57 = vld [vmem:[%s1484_s1] sm:$0xff] (!%p188_p2) }
   0xa   : > { %s1310_s11 = smov (!%p188_p2), 96   ;;  %s1311_s14 = smov (!%p188_p2), 95   ;;  %v1314_v60 = vmov (!%p188_p2), 0   ;;  %v1124_v62 = vld [vmem:[%s1486_s3] sm:$0xff] (!%p188_p2)  ;;  %vm744_vm9 = vcmask (!%p188_p2), 900096   ;;  %vm847_vm10 = vcmask (!%p188_p2), 785408  }
   0xb   : > { %v421_v6 = vrot.slane (!%p188_p2), %v1218_v2, %v231_v4  ;;  %v425_v7 = vrot.slane (!%p188_p2), %v1218_v2, %v235_v5  ;;  %v232_v8 = vrot.slane (!%p188_p2), %v227_v3, %v231_v4  ;;  %v236_v9 = vrot.slane (!%p188_p2), %v227_v3, %v235_v5  ;;  %s1312_s15 = smov (!%p188_p2), 126   ;;  %s1313_s22 = smov (!%p188_p2), 112   ;;  %1290 = vset.pattern.permute.xlu1 (!%p188_p2), %v1314_v60  ;;  %v1132_v63 = vld [vmem:[%s1487_s4] sm:$0xff] (!%p188_p2) }
   0xc   : > { %s1315_s23 = smov (!%p188_p2), 94   ;;  %1291 = vset.pattern.permute.xlu0 (!%p188_p2), %v1314_v60  ;;  %vm447_vm11 = vcmask (!%p188_p2), 1031168   ;;  %vm938_vm12 = vcmask (!%p188_p2), 777216   ;;  %vm550_vm13 = vcmask (!%p188_p2), 916480   ;;  %vm1041_vm14 = vcmask (!%p188_p2), 769024  }
   0xd   : > { %s1490_s19 = smov (!%p215_p3, %s1203_s19), 1  ;;  %v426_v10 = vcombine.low %v421_v6, %v425_v7  ;;  %v237_v11 = vcombine.low %v232_v8, %v236_v9  ;;  %v1231_v7 = vld [vmem:[%s1484_s1 + $0x28] sm:$0xff] }
   0xe   : > { %s1266_s24 = smul.u32 12, %s1490_s19 }
   0xf   : > { %724 = vrot.lane.b32.xlu0 %v426_v10, %s1301_s28  ;;  %427 = vrot.lane.b32.xlu1 %v426_v10, %s1302_s29 }
  0x10   : > { %s219_s27 = scalar_lea.vmem %s1483_s0, %s1266_s24 }
  0x11   : > { %v1366_v12 = vld [vmem:[%s219_s27] sm:$0xff]  ;;  %v1370_v14 = vld [vmem:[%s219_s27 + $0x8] sm:$0xf] }
  0x12   : > { %v245_v13 = vcombine.high %v1366_v12, %v1366_v12  ;;  %v239_v39 = vmul.f32 %v237_v11, %v1366_v12 }
  0x13   : > { %827 = vrot.lane.b32.xlu0 %v237_v11, %s1303_s30  ;;  %530 = vrot.lane.b32.xlu1 %v237_v11, %s1304_s6 }
  0x14   : > { %v336_v47 = vcombine.high %v239_v39, %v239_v39 }
  0x17   : > { %1021 = vrot.lane.b32.xlu0 %v426_v10, %s1305_s7  ;;  %637 = vrot.lane.b32.xlu1 %v245_v13, %s1306_s8 }
  0x1b   : > { %639 = vrot.lane.b32.xlu0 %v1370_v14, %s1306_s8  ;;  %635 = vrot.lane.b32.xlu1 %v1366_v12, %s1306_s8 }
  0x1f   : > { %248 = vrot.lane.b32.xlu0 %v245_v13, %s1307_s9  ;;  %250 = vrot.lane.b32.xlu1 %v1370_v14, %s1307_s9 }
  0x23   : > { %246 = vrot.lane.b32.xlu0 %v1366_v12, %s1307_s9 }
  0x81   : > { %v725_v16 = vpop.permute.xlu0 %724  ;;  %v428_v17 = vpop.permute.xlu1 %427 }
  0x82   : > { %v726_v18 = vrot.slane %v725_v16, 4  ;;  %v429_v30 = vrot.slane %v428_v17, 4 }
  0x84   : > { %v732_v19 = vmul.f32 %v726_v18, %v1370_v14  ;;  %v728_v22 = vsel %vm727_vm0, %v726_v18, %v725_v16  ;;  %v435_v37 = vmul.f32 %v429_v30, %v1370_v14  ;;  %v431_v40 = vsel %vm430_vm4, %v429_v30, %v428_v17  ;;  %v1223_v30 = vld [vmem:[%s1484_s1 + $0x18] sm:$0xff] }
  0x85   : > { %v828_v20 = vpop.permute.xlu0 %827  ;;  %v1379_v21 = vpop.permute.xlu1 %530  ;;  %v731_v26 = vmul.f32 %v728_v22, %v1366_v12  ;;  %v434_v46 = vmul.f32 %v431_v40, %v1366_v12 }
  0x86   : > { %v829_v23 = vrot.slane %v828_v20, 4  ;;  %742 = vrot.lane.b32.xlu1 %v732_v19, %s1309_s10  ;;  %v532_v38 = vrot.slane %v1379_v21, 4 }
  0x87   : > { %v737_v31 = vcombine.high %v731_v26, %v731_v26  ;;  %v440_v54 = vcombine.high %v434_v46, %v434_v46 }
  0x88   : > { %v831_v24 = vsel %vm830_vm1, %v829_v23, %v828_v20  ;;  %v835_v25 = vmul.f32 %v829_v23, %v1370_v14  ;;  %v534_v44 = vsel %vm533_vm7, %v532_v38, %v1379_v21  ;;  %v538_v59 = vmul.f32 %v532_v38, %v1370_v14  ;;  %v1219_v20 = vld [vmem:[%s1484_s1 + $0x10] sm:$0xff] }
  0x89   : > { %v834_v27 = vmul.f32 %v831_v24, %v1366_v12  ;;  %v1384_v28 = vpop.permute.xlu0 %1021  ;;  %v638_v29 = vpop.permute.xlu1 %637  ;;  %v537_v51 = vmul.f32 %v534_v44, %v1366_v12 }
  0x8a   : > { %845 = vrot.lane.b32.xlu1 %v835_v25, %s1310_s11  ;;  %v1023_v45 = vrot.slane %v1384_v28, 4  ;;  %v1239_v25 = vld [vmem:[%s1484_s1 + $0x38] sm:$0xff] }
  0x8b   : > { %841 = vrot.lane.b32.xlu0 %v834_v27, %s1310_s11  ;;  %v840_v48 = vcombine.high %v834_v27, %v834_v27  ;;  %v543_v56 = vcombine.high %v537_v51, %v537_v51 }
  0x8c   : > { %v1025_v53 = vsel %vm1024_vm8, %v1023_v45, %v1384_v28  ;;  %v1029_v61 = vmul.f32 %v1023_v45, %v1370_v14 }
  0x8d   : > { %v640_v32 = vpop.permute.xlu0 %639  ;;  %v636_v33 = vpop.permute.xlu1 %635  ;;  %v1028_v55 = vmul.f32 %v1025_v53, %v1366_v12 }
  0x8e   : > { %738 = vrot.lane.b32.xlu1 %v731_v26, %s1309_s10  ;;  %v643_v34 = vsel %vm641_vm2, %v638_v29, %v640_v32  ;;  %v642_v35 = vsel %vm641_vm2, %v636_v33, %v638_v29 }
  0x8f   : > { %740 = vrot.lane.b32.xlu0 %v737_v31, %s1309_s10  ;;  %1228 = vmatprep.subr.msk.mxu0 %vm259_vm3, %v643_v34  ;;  %v1034_v58 = vcombine.high %v1028_v55, %v1028_v55 }
  0x90   : > { %1229 = vmatpush1.msk.msra.mxu0 %vm259_vm3, %v642_v35 }
  0x91   : > { %v249_v41 = vpop.permute.xlu0 %248  ;;  %v251_v42 = vpop.permute.xlu1 %250  ;;  %1230 = vmatmul.mubr.msk.f32.vlgmr.msra.gmra.mrb[0].mxu0 %vm255_vm5, %v1227_v36 }
  0x92   : > { %934 = vrot.lane.b32.xlu1 %v245_v13, %s1311_s14  ;;  %v254_v43 = vsel %vm252_vm6, %v249_v41, %v251_v42  ;;  %818 = vmatprep.mubr.f32.mxu0 %v1308_v15 }
  0x93   : > { %445 = vrot.lane.b32.xlu0 %v435_v37, %s1312_s15  ;;  %1212 = vmatprep.subr.msk.mxu1 %vm259_vm3, %v254_v43 }
  0x95   : > { %v247_v49 = vpop.permute.xlu0 %246 }
  0x96   : > { %441 = vrot.lane.b32.xlu1 %v434_v46, %s1312_s15  ;;  %v253_v52 = vsel %vm252_vm6, %v247_v49, %v249_v41 }
  0x97   : > { %843 = vrot.lane.b32.xlu0 %v840_v48, %s1310_s11  ;;  %1213 = vmatpush1.msk.msra.mxu1 %vm259_vm3, %v253_v52 }
  0x98   : > { %1214 = vmatmul.mubr.msk.f32.vlgmr.msra.gmra.mrb[0].mxu1 %vm255_vm5, %v1211_v50  ;;  %1215 = vmatprep.subr.msk.mxu1 %vm259_vm3, %v336_v47 }
  0x99   : > { %1216 = vmatpush1.msk.msra.mxu1 %vm259_vm3, %v239_v39  ;;  %408 = vmatprep.mubr.f32.mxu1 %v1308_v15 }
  0x9a   : > { %443 = vrot.lane.b32.xlu1 %v440_v54, %s1312_s15  ;;  %s1249_s15 = sshll.u32 %s1490_s19, 4 }
  0x9b   : > { %936 = vrot.lane.b32.xlu0 %v1370_v14, %s1311_s14  ;;  %v1235_v14 = vld [vmem:[%s1484_s1 + $0x30] sm:$0xff]  ;;  %s224_s20 = scalar_lea.vmem %s1488_s5, %s1249_s15 }
  0x9e   : > { %546 = vrot.lane.b32.xlu1 %v543_v56, %s1313_s22 }
  0x9f   : > { %932 = vrot.lane.b32.xlu0 %v1366_v12, %s1311_s14 }
  0xa0   : > { %1217 = vmatmul.mubr.msk.f32.vlgmr.msra.gmra.mrb[0].mxu1 %vm255_vm5, %v240_v57 }
  0xa1   : > { %521 = vmatprep.mubr.f32.mxu1 %v1308_v15 }
  0xa2   : > { %1037 = vrot.lane.b32.xlu1 %v1034_v58, %s1315_s23 }
  0xa3   : > { %548 = vrot.lane.b32.xlu0 %v538_v59, %s1313_s22 }
  0xa6   : > { %544 = vrot.lane.b32.xlu1 %v537_v51, %s1313_s22 }
  0xa7   : > { %1039 = vrot.lane.b32.xlu0 %v1029_v61, %s1315_s23 }
  0xaa   : > { %1127 = vperm.xlu1 %1290, %v1124_v62  }
  0xab   : > { %1035 = vrot.lane.b32.xlu0 %v1028_v55, %s1315_s23 }
  0xaf   : > { %1135 = vperm.xlu0 %1291, %v1132_v63  }
  0xf8   : > { %v743_v0 = vpop.permute.xlu1 %742 }
  0xfc   : > { %v846_v1 = vpop.permute.xlu1 %845 }
  0xfd   : > { %v842_v2 = vpop.permute.xlu0 %841 }
 0x100   : > { %v739_v3 = vpop.permute.xlu1 %738 }
 0x101   : > { %v741_v4 = vpop.permute.xlu0 %740 }
 0x102   : > { %v745_v5 = vsel %vm744_vm9, %v739_v3, %v741_v4  ;;  %v746_v6 = vsel %vm744_vm9, %v741_v4, %v743_v0 }
 0x103   : > { %1232 = vmatprep.subr.msk.mxu0 %vm259_vm3, %v746_v6 }
 0x104   : > { %1233 = vmatpush1.msk.msra.mxu0 %vm259_vm3, %v745_v5  ;;  %v935_v8 = vpop.permute.xlu1 %934 }
 0x105   : > { %v446_v9 = vpop.permute.xlu0 %445  ;;  %1234 = vmatmul.mubr.msk.f32.vlgmr.msra.gmra.mrb[0].mxu0 %vm255_vm5, %v1231_v7 }
 0x106   : > { %921 = vmatprep.mubr.f32.mxu0 %v1308_v15 }
 0x108   : > { %v442_v10 = vpop.permute.xlu1 %441 }
 0x109   : > { %v844_v11 = vpop.permute.xlu0 %843 }
 0x10a   : > { %v848_v12 = vsel %vm847_vm10, %v842_v2, %v844_v11  ;;  %v849_v13 = vsel %vm847_vm10, %v844_v11, %v846_v1 }
 0x10b   : > { %1236 = vmatprep.subr.msk.mxu0 %vm259_vm3, %v849_v13 }
 0x10c   : > { %1237 = vmatpush1.msk.msra.mxu0 %vm259_vm3, %v848_v12  ;;  %v444_v16 = vpop.permute.xlu1 %443 }
 0x10d   : > { %v448_v17 = vsel %vm447_vm11, %v442_v10, %v444_v16  ;;  %v449_v18 = vsel %vm447_vm11, %v444_v16, %v446_v9  ;;  %v937_v19 = vpop.permute.xlu0 %936  ;;  %1238 = vmatmul.mubr.msk.f32.vlgmr.msra.gmra.mrb[0].mxu0 %vm255_vm5, %v1235_v14 }
 0x10e   : > { %v940_v21 = vsel %vm938_vm12, %v935_v8, %v937_v19  ;;  %1220 = vmatprep.subr.msk.mxu1 %vm259_vm3, %v449_v18  ;;  %1012 = vmatprep.mubr.f32.mxu0 %v1308_v15 }
 0x10f   : > { %1221 = vmatpush1.msk.msra.mxu1 %vm259_vm3, %v448_v17  ;;  %1240 = vmatprep.subr.msk.mxu0 %vm259_vm3, %v940_v21 }
 0x110   : > { %v547_v22 = vpop.permute.xlu1 %546  ;;  %1222 = vmatmul.mubr.msk.f32.vlgmr.msra.gmra.mrb[0].mxu1 %vm255_vm5, %v1219_v20 }
 0x111   : > { %v933_v23 = vpop.permute.xlu0 %932  ;;  %624 = vmatprep.mubr.f32.mxu1 %v1308_v15 }
 0x112   : > { %v939_v24 = vsel %vm938_vm12, %v933_v23, %v935_v8 }
 0x113   : > { %1241 = vmatpush1.msk.msra.mxu0 %vm259_vm3, %v939_v24 }
 0x114   : > { %v1038_v26 = vpop.permute.xlu1 %1037 }
 0x115   : > { %v549_v27 = vpop.permute.xlu0 %548  ;;  %1242 = vmatmul.mubr.msk.f32.vlgmr.msra.gmra.mrb[0].mxu0 %vm255_vm5, %v1239_v25 }
 0x116   : > { %v552_v28 = vsel %vm550_vm13, %v547_v22, %v549_v27  ;;  %1115 = vmatprep.mubr.f32.mxu0 %v1308_v15  ;;  %v1243_v15 = vld [vmem:[%s1484_s1 + $0x40] sm:$0xff] }
 0x117   : > { %1224 = vmatprep.subr.msk.mxu1 %vm259_vm3, %v552_v28 }
 0x118   : > { %v545_v29 = vpop.permute.xlu1 %544 }
 0x119   : > { %v551_v31 = vsel %vm550_vm13, %v545_v29, %v547_v22  ;;  %v1040_v32 = vpop.permute.xlu0 %1039 }
 0x11a   : > { %v1043_v33 = vsel %vm1041_vm14, %v1038_v26, %v1040_v32  ;;  %1225 = vmatpush1.msk.msra.mxu1 %vm259_vm3, %v551_v31 }
 0x11b   : > { %1226 = vmatmul.mubr.msk.f32.vlgmr.msra.gmra.mrb[0].mxu1 %vm255_vm5, %v1223_v30  ;;  %1244 = vmatprep.subr.msk.mxu0 %vm259_vm3, %v1043_v33 }
 0x11d   : > { %v1036_v34 = vpop.permute.xlu0 %1035 }
 0x11e   : > { %v1042_v35 = vsel %vm1041_vm14, %v1036_v34, %v1038_v26 }
 0x11f   : > { %1245 = vmatpush1.msk.msra.mxu0 %vm259_vm3, %v1042_v35 }
 0x120   : > { %1246 = vmatmul.mubr.msk.f32.vlgmr.msra.gmra.mrb[0].mxu0 %vm255_vm5, %v1243_v15 }
 0x129   : > { %v1128_v39 = vpop.permute.xlu1 %1127 }
 0x12e   : > { %v1136_v43 = vpop.permute.xlu0 %1135 }
 0x1ee   : > { %v626_v36 = vpop.f32.mrb[0].mxu1 }
 0x1ef   : > { %v628_v37 = vpop.f32.mrb[1].mxu1 }
 0x1f3   : > { %v1117_v38 = vpop.f32.mrb[0].mxu0 }
 0x1f4   : > { %v1250_v40 = vadd.f32 %v1117_v38, %v626_v36  ;;  %v1119_v41 = vpop.f32.mrb[1].mxu0 }
 0x1f5   : > { %v1251_v42 = vadd.f32 %v1119_v41, %v628_v37 }
 0x1f6   : > { %v1130_v44 = vmul.f32 %v1250_v40, %v1128_v39 }
 0x1f7   : > { %v1131_v45 = vmul.f32 %v1251_v42, %v1128_v39 }
 0x1f8   : > { %v1138_v46 = vadd.f32 %v1136_v43, %v1130_v44 }
 0x1f9   : > { %v1139_v47 = vadd.f32 %v1136_v43, %v1131_v45 }
 0x1fa   : > { %vm1140_vm15 = vcmp.gt.f32.partialorder %v1138_v46, 0.0  ;;  %v1142_v48 = vmul.f32 0.1, %v1138_v46 }
 0x1fb   : > { %vm1141_vm0 = vcmp.gt.f32.partialorder %v1139_v47, 0.0  ;;  %v1143_v49 = vmul.f32 0.1, %v1139_v47 }
 0x1fc   : > { %v1144_v50 = vsel %vm1140_vm15, %v1138_v46, %v1142_v48 }
 0x1fd   : > { %v1145_v51 = vsel %vm1141_vm0, %v1139_v47, %v1143_v49  ;;  %1146 = vst [vmem:[%s224_s20] sm:$0xff] %v1144_v50 }
 0x1fe   : > { %1147 = vst [vmem:[%s224_s20 + $0x8] sm:$0xff] %v1145_v51 }
 0x1ff PF: > { %s15_s18 = sadd.s32 1, %s1299_s18  }
 0x200   : > { %p12_p4 = scmp.ge.s32.totalorder %s15_s18, 4  }
 0x202   :  { %14 = sbr.rel (!%p12_p4) target bundleno = 1 (0x1), region = 79 }

</bundles_post_ra>
